<compile_context>
chip_gen: v7x
topology: tpu7x:2x2x1
jax: 0.10.0
libtpu: 0.0.40
codegen_flags: <defaults>
</compile_context>

<pallas_src>
import functools

import jax
import jax.numpy as jnp
import numpy as np
from jax.experimental import pallas as pl
from jax.experimental.pallas import tpu as pltpu


def _small_rnn_kernel(B, S, H, C,
                      ids_ref, tproj_ref, whh_ref, b_ref,
                      wlin_ref, blin_ref, out_ref):
    """Whole forward pass for one small batch.

    ids_ref   : (S*B, 1) int32   flattened seq-major token ids
    tproj_ref : (V, 4H)  f32     table @ W_ih.T  (embedding fused with input proj)
    whh_ref   : (H, 4H)  f32     LSTM hidden weights (transposed, gate order i,f,g,o)
    b_ref     : (1, 4H)  f32     bias_ih + bias_hh
    wlin_ref  : (H, C)   f32     classifier weights (transposed)
    blin_ref  : (1, C)   f32     classifier bias
    out_ref   : (B, C)   f32     log-softmax output
    """
    V = tproj_ref.shape[0]
    N = S * B

    # ---- fused embedding + input projection (one lane-dense MXU matmul) ----
    ids = ids_ref[...]                                                  # (N, 1)
    vocab_iota = jax.lax.broadcasted_iota(jnp.int32, (N, V), 1)         # (N, V)
    onehot = (vocab_iota == ids).astype(jnp.float32)
    xw = jnp.dot(onehot, tproj_ref[...],
                 preferred_element_type=jnp.float32) + b_ref[...]       # (N, 4H)

    whh = whh_ref[...]

    # ---- LSTM recurrence over time (PyTorch gate order: i, f, g, o) ----
    # Fully unrolled: S is small and static, xw slices are static, and only the
    # dependent h @ W_hh matmul sits on the serial critical path per step.
    h = jnp.zeros((B, H), jnp.float32)
    c = jnp.zeros((B, H), jnp.float32)
    for t in range(S):
        gates = (jnp.dot(h, whh, preferred_element_type=jnp.float32)
                 + xw[t * B:(t + 1) * B, :])                            # (B, 4H)
        # full-vreg nonlinearities, then slice the results
        sig_all = pl.reciprocal(1.0 + jnp.exp(-gates), approx=True)     # (B, 4H)
        tnh_all = jnp.tanh(gates)                                       # (B, 4H)
        i_g = sig_all[:, 0:H]
        f_g = sig_all[:, H:2 * H]
        g_g = tnh_all[:, 2 * H:3 * H]
        o_g = sig_all[:, 3 * H:4 * H]
        c = f_g * c + i_g * g_g
        h = o_g * jnp.tanh(c)

    # ---- classifier + log-softmax (dim=1, matching legacy nn.LogSoftmax) ----
    logits = (jnp.dot(h, wlin_ref[...], preferred_element_type=jnp.float32)
              + blin_ref[...])                                          # (B, C)
    m = jnp.max(logits, axis=1, keepdims=True)
    lse = m + jnp.log(jnp.sum(jnp.exp(logits - m), axis=1, keepdims=True))
    out_ref[...] = logits - lse


def small_rnn_forward(ids_bs, params):
    """ids_bs: (B, S) int32 token ids.  Returns (B, classes) f32 log-probs."""
    table, w_ih, w_hh, b_ih, b_hh, w_lin, b_lin = params
    B, S = ids_bs.shape
    V, E = table.shape
    H = w_hh.shape[1]
    C = w_lin.shape[0]

    # glue: seq-major flatten + weight fusion / transposes
    ids_flat = ids_bs.T.reshape(S * B, 1).astype(jnp.int32)
    table_proj = jnp.dot(table, w_ih.T)       # (V, 4H)  embedding fused with W_ih
    whh_t = w_hh.T                            # (H, 4H)
    bias = (b_ih + b_hh).reshape(1, 4 * H)
    wlin_t = w_lin.T                          # (H, C)
    blin = b_lin.reshape(1, C)

    kernel = functools.partial(_small_rnn_kernel, B, S, H, C)
    vmem = pl.BlockSpec(memory_space=pltpu.MemorySpace.VMEM)
    # TODO(synk): at production vocab sizes (V~20k-50k) switch the table to
    # memory_space=pl.ANY + scalar-prefetched DMA gather instead of the
    # resident one-hot matmul (VMEM ceiling, especially on v7x).
    return pl.pallas_call(
        kernel,
        out_shape=jax.ShapeDtypeStruct((B, C), jnp.float32),
        in_specs=[vmem] * 6,
        out_specs=vmem,
    )(ids_flat, table_proj, whh_t, bias, wlin_t, blin)


def small_rnn_reference(ids_bs, params):
    """Pure-JAX reference mirroring torch smallRNN.forward."""
    table, w_ih, w_hh, b_ih, b_hh, w_lin, b_lin = params
    B, S = ids_bs.shape
    H = w_hh.shape[1]
    embd = table[ids_bs]                              # (B, S, E)
    x = jnp.transpose(embd, (1, 0, 2))                # (S, B, E)
    h = jnp.zeros((B, H), jnp.float32)
    c = jnp.zeros((B, H), jnp.float32)
    for t in range(S):
        gates = x[t] @ w_ih.T + h @ w_hh.T + b_ih + b_hh
        i_g = jax.nn.sigmoid(gates[:, 0:H])
        f_g = jax.nn.sigmoid(gates[:, H:2 * H])
        g_g = jnp.tanh(gates[:, 2 * H:3 * H])
        o_g = jax.nn.sigmoid(gates[:, 3 * H:4 * H])
        c = f_g * c + i_g * g_g
        h = o_g * jnp.tanh(c)
    logits = h @ w_lin.T + b_lin
    return jax.nn.log_softmax(logits, axis=1)


if __name__ == "__main__":
    # Small, TPU-friendly instantiation of smallRNN:
    #   classes=4, bidirection=False, layernum=1,
    #   length(vocab)=512, embedding_size=32, hiddensize=32
    B, S = 8, 8          # batch, sequence length
    V, E, H, C = 512, 32, 32, 4

    key = jax.random.PRNGKey(0)
    ks = jax.random.split(key, 8)

    bound = 1.0 / float(np.sqrt(H))
    table = jax.random.normal(ks[0], (V, E), jnp.float32)                     # nn.Embedding ~ N(0,1)
    w_ih = jax.random.uniform(ks[1], (4 * H, E), jnp.float32, -bound, bound)  # LSTM weight_ih_l0
    w_hh = jax.random.uniform(ks[2], (4 * H, H), jnp.float32, -bound, bound)  # LSTM weight_hh_l0
    b_ih = jax.random.uniform(ks[3], (4 * H,), jnp.float32, -bound, bound)
    b_hh = jax.random.uniform(ks[4], (4 * H,), jnp.float32, -bound, bound)
    w_lin = jax.random.uniform(ks[5], (C, H), jnp.float32, -bound, bound)     # nn.Linear weight
    b_lin = jax.random.uniform(ks[6], (C,), jnp.float32, -bound, bound)
    params = (table, w_ih, w_hh, b_ih, b_hh, w_lin, b_lin)

    ids = jax.random.randint(ks[7], (B, S), 0, V, dtype=jnp.int32)

    out = small_rnn_forward(ids, params)
    out = jax.block_until_ready(out)

    ref = small_rnn_reference(ids, params)
    np.testing.assert_allclose(np.asarray(out), np.asarray(ref),
                               rtol=1e-3, atol=1e-3)
    assert out.shape == (B, C) and out.dtype == jnp.float32

    print("KERNEL_OK")
</pallas_src>

<mosaic_0001>
module attributes {stable_mosaic.version = 11 : i64} {
  func.func @_small_rnn_kernel(%arg0: memref<64x1xi32, #tpu.memory_space<vmem>>, %arg1: memref<512x128xf32, #tpu.memory_space<vmem>>, %arg2: memref<32x128xf32, #tpu.memory_space<vmem>>, %arg3: memref<1x128xf32, #tpu.memory_space<vmem>>, %arg4: memref<32x4xf32, #tpu.memory_space<vmem>>, %arg5: memref<1x4xf32, #tpu.memory_space<vmem>>, %arg6: memref<8x4xf32, #tpu.memory_space<vmem>>) attributes {dimension_semantics = [], scalar_prefetch = 0 : i64, scratch_operands = 0 : i64, tpu.core_type = #tpu.core_type<tc>} {
    %c0 = arith.constant 0 : index
    %c0_0 = arith.constant 0 : index
    %0 = vector.load %arg0[%c0, %c0_0] : memref<64x1xi32, #tpu.memory_space<vmem>>, vector<64x1xi32>
    %1 = tpu.iota {dimensions = array<i32: 1>} : vector<64x512xi32>
    %2 = vector.broadcast %0 : vector<64x1xi32> to vector<64x512xi32>
    %3 = arith.cmpi eq, %1, %2 : vector<64x512xi32>
    %4 = arith.extui %3 : vector<64x512xi1> to vector<64x512xi32>
    %5 = arith.sitofp %4 : vector<64x512xi32> to vector<64x512xf32>
    %c0_1 = arith.constant 0 : index
    %c0_2 = arith.constant 0 : index
    %6 = vector.load %arg1[%c0_1, %c0_2] : memref<512x128xf32, #tpu.memory_space<vmem>>, vector<512x128xf32>
    %cst = arith.constant dense<0.000000e+00> : vector<64x128xf32>
    %7 = tpu.matmul %5, %6, %cst {dimension_numbers = #tpu.dot_dimension_numbers<[1], [0], [0], [1], [0, 0, 1, 1], [], []>} : vector<64x512xf32>, vector<512x128xf32>, vector<64x128xf32> -> vector<64x128xf32>
    %c0_3 = arith.constant 0 : index
    %c0_4 = arith.constant 0 : index
    %8 = vector.load %arg3[%c0_3, %c0_4] : memref<1x128xf32, #tpu.memory_space<vmem>>, vector<1x128xf32>
    %9 = vector.broadcast %8 : vector<1x128xf32> to vector<64x128xf32>
    %10 = arith.addf %7, %9 : vector<64x128xf32>
    %c0_5 = arith.constant 0 : index
    %c0_6 = arith.constant 0 : index
    %11 = vector.load %arg2[%c0_5, %c0_6] : memref<32x128xf32, #tpu.memory_space<vmem>>, vector<32x128xf32>
    %cst_7 = arith.constant 0.000000e+00 : f32
    %12 = vector.broadcast %cst_7 : f32 to vector<8x32xf32>
    %cst_8 = arith.constant 0.000000e+00 : f32
    %13 = vector.broadcast %cst_8 : f32 to vector<8x32xf32>
    %cst_9 = arith.constant dense<0.000000e+00> : vector<8x128xf32>
    %14 = tpu.matmul %12, %11, %cst_9 {dimension_numbers = #tpu.dot_dimension_numbers<[1], [0], [0], [1], [0, 0, 1, 1], [], []>} : vector<8x32xf32>, vector<32x128xf32>, vector<8x128xf32> -> vector<8x128xf32>
    %15 = vector.extract_strided_slice %10 {offsets = [0, 0], sizes = [8, 128], strides = [1, 1]} : vector<64x128xf32> to vector<8x128xf32>
    %16 = arith.addf %14, %15 : vector<8x128xf32>
    %cst_10 = arith.constant 0.000000e+00 : f32
    %17 = vector.broadcast %cst_10 : f32 to vector<8x128xf32>
    %18 = arith.subf %17, %16 : vector<8x128xf32>
    %19 = math.exp %18 : vector<8x128xf32>
    %cst_11 = arith.constant 1.000000e+00 : f32
    %20 = vector.broadcast %cst_11 : f32 to vector<8x128xf32>
    %21 = arith.addf %20, %19 : vector<8x128xf32>
    %22 = tpu.reciprocal %21 {approx = true} : vector<8x128xf32> -> vector<8x128xf32>
    %23 = math.tanh %16 : vector<8x128xf32>
    %24 = vector.extract_strided_slice %22 {offsets = [0, 0], sizes = [8, 32], strides = [1, 1]} : vector<8x128xf32> to vector<8x32xf32>
    %25 = vector.extract_strided_slice %22 {offsets = [0, 32], sizes = [8, 32], strides = [1, 1]} : vector<8x128xf32> to vector<8x32xf32>
    %26 = vector.extract_strided_slice %23 {offsets = [0, 64], sizes = [8, 32], strides = [1, 1]} : vector<8x128xf32> to vector<8x32xf32>
    %27 = vector.extract_strided_slice %22 {offsets = [0, 96], sizes = [8, 32], strides = [1, 1]} : vector<8x128xf32> to vector<8x32xf32>
    %28 = arith.mulf %25, %13 : vector<8x32xf32>
    %29 = arith.mulf %24, %26 : vector<8x32xf32>
    %30 = arith.addf %28, %29 : vector<8x32xf32>
    %31 = math.tanh %30 : vector<8x32xf32>
    %32 = arith.mulf %27, %31 : vector<8x32xf32>
    %cst_12 = arith.constant dense<0.000000e+00> : vector<8x128xf32>
    %33 = tpu.matmul %32, %11, %cst_12 {dimension_numbers = #tpu.dot_dimension_numbers<[1], [0], [0], [1], [0, 0, 1, 1], [], []>} : vector<8x32xf32>, vector<32x128xf32>, vector<8x128xf32> -> vector<8x128xf32>
    %34 = vector.extract_strided_slice %10 {offsets = [8, 0], sizes = [8, 128], strides = [1, 1]} : vector<64x128xf32> to vector<8x128xf32>
    %35 = arith.addf %33, %34 : vector<8x128xf32>
    %cst_13 = arith.constant 0.000000e+00 : f32
    %36 = vector.broadcast %cst_13 : f32 to vector<8x128xf32>
    %37 = arith.subf %36, %35 : vector<8x128xf32>
    %38 = math.exp %37 : vector<8x128xf32>
    %cst_14 = arith.constant 1.000000e+00 : f32
    %39 = vector.broadcast %cst_14 : f32 to vector<8x128xf32>
    %40 = arith.addf %39, %38 : vector<8x128xf32>
    %41 = tpu.reciprocal %40 {approx = true} : vector<8x128xf32> -> vector<8x128xf32>
    %42 = math.tanh %35 : vector<8x128xf32>
    %43 = vector.extract_strided_slice %41 {offsets = [0, 0], sizes = [8, 32], strides = [1, 1]} : vector<8x128xf32> to vector<8x32xf32>
    %44 = vector.extract_strided_slice %41 {offsets = [0, 32], sizes = [8, 32], strides = [1, 1]} : vector<8x128xf32> to vector<8x32xf32>
    %45 = vector.extract_strided_slice %42 {offsets = [0, 64], sizes = [8, 32], strides = [1, 1]} : vector<8x128xf32> to vector<8x32xf32>
    %46 = vector.extract_strided_slice %41 {offsets = [0, 96], sizes = [8, 32], strides = [1, 1]} : vector<8x128xf32> to vector<8x32xf32>
    %47 = arith.mulf %44, %30 : vector<8x32xf32>
    %48 = arith.mulf %43, %45 : vector<8x32xf32>
    %49 = arith.addf %47, %48 : vector<8x32xf32>
    %50 = math.tanh %49 : vector<8x32xf32>
    %51 = arith.mulf %46, %50 : vector<8x32xf32>
    %cst_15 = arith.constant dense<0.000000e+00> : vector<8x128xf32>
    %52 = tpu.matmul %51, %11, %cst_15 {dimension_numbers = #tpu.dot_dimension_numbers<[1], [0], [0], [1], [0, 0, 1, 1], [], []>} : vector<8x32xf32>, vector<32x128xf32>, vector<8x128xf32> -> vector<8x128xf32>
    %53 = vector.extract_strided_slice %10 {offsets = [16, 0], sizes = [8, 128], strides = [1, 1]} : vector<64x128xf32> to vector<8x128xf32>
    %54 = arith.addf %52, %53 : vector<8x128xf32>
    %cst_16 = arith.constant 0.000000e+00 : f32
    %55 = vector.broadcast %cst_16 : f32 to vector<8x128xf32>
    %56 = arith.subf %55, %54 : vector<8x128xf32>
    %57 = math.exp %56 : vector<8x128xf32>
    %cst_17 = arith.constant 1.000000e+00 : f32
    %58 = vector.broadcast %cst_17 : f32 to vector<8x128xf32>
    %59 = arith.addf %58, %57 : vector<8x128xf32>
    %60 = tpu.reciprocal %59 {approx = true} : vector<8x128xf32> -> vector<8x128xf32>
    %61 = math.tanh %54 : vector<8x128xf32>
    %62 = vector.extract_strided_slice %60 {offsets = [0, 0], sizes = [8, 32], strides = [1, 1]} : vector<8x128xf32> to vector<8x32xf32>
    %63 = vector.extract_strided_slice %60 {offsets = [0, 32], sizes = [8, 32], strides = [1, 1]} : vector<8x128xf32> to vector<8x32xf32>
    %64 = vector.extract_strided_slice %61 {offsets = [0, 64], sizes = [8, 32], strides = [1, 1]} : vector<8x128xf32> to vector<8x32xf32>
    %65 = vector.extract_strided_slice %60 {offsets = [0, 96], sizes = [8, 32], strides = [1, 1]} : vector<8x128xf32> to vector<8x32xf32>
    %66 = arith.mulf %63, %49 : vector<8x32xf32>
    %67 = arith.mulf %62, %64 : vector<8x32xf32>
    %68 = arith.addf %66, %67 : vector<8x32xf32>
    %69 = math.tanh %68 : vector<8x32xf32>
    %70 = arith.mulf %65, %69 : vector<8x32xf32>
    %cst_18 = arith.constant dense<0.000000e+00> : vector<8x128xf32>
    %71 = tpu.matmul %70, %11, %cst_18 {dimension_numbers = #tpu.dot_dimension_numbers<[1], [0], [0], [1], [0, 0, 1, 1], [], []>} : vector<8x32xf32>, vector<32x128xf32>, vector<8x128xf32> -> vector<8x128xf32>
    %72 = vector.extract_strided_slice %10 {offsets = [24, 0], sizes = [8, 128], strides = [1, 1]} : vector<64x128xf32> to vector<8x128xf32>
    %73 = arith.addf %71, %72 : vector<8x128xf32>
    %cst_19 = arith.constant 0.000000e+00 : f32
    %74 = vector.broadcast %cst_19 : f32 to vector<8x128xf32>
    %75 = arith.subf %74, %73 : vector<8x128xf32>
    %76 = math.exp %75 : vector<8x128xf32>
    %cst_20 = arith.constant 1.000000e+00 : f32
    %77 = vector.broadcast %cst_20 : f32 to vector<8x128xf32>
    %78 = arith.addf %77, %76 : vector<8x128xf32>
    %79 = tpu.reciprocal %78 {approx = true} : vector<8x128xf32> -> vector<8x128xf32>
    %80 = math.tanh %73 : vector<8x128xf32>
    %81 = vector.extract_strided_slice %79 {offsets = [0, 0], sizes = [8, 32], strides = [1, 1]} : vector<8x128xf32> to vector<8x32xf32>
    %82 = vector.extract_strided_slice %79 {offsets = [0, 32], sizes = [8, 32], strides = [1, 1]} : vector<8x128xf32> to vector<8x32xf32>
    %83 = vector.extract_strided_slice %80 {offsets = [0, 64], sizes = [8, 32], strides = [1, 1]} : vector<8x128xf32> to vector<8x32xf32>
    %84 = vector.extract_strided_slice %79 {offsets = [0, 96], sizes = [8, 32], strides = [1, 1]} : vector<8x128xf32> to vector<8x32xf32>
    %85 = arith.mulf %82, %68 : vector<8x32xf32>
    %86 = arith.mulf %81, %83 : vector<8x32xf32>
    %87 = arith.addf %85, %86 : vector<8x32xf32>
    %88 = math.tanh %87 : vector<8x32xf32>
    %89 = arith.mulf %84, %88 : vector<8x32xf32>
    %cst_21 = arith.constant dense<0.000000e+00> : vector<8x128xf32>
    %90 = tpu.matmul %89, %11, %cst_21 {dimension_numbers = #tpu.dot_dimension_numbers<[1], [0], [0], [1], [0, 0, 1, 1], [], []>} : vector<8x32xf32>, vector<32x128xf32>, vector<8x128xf32> -> vector<8x128xf32>
    %91 = vector.extract_strided_slice %10 {offsets = [32, 0], sizes = [8, 128], strides = [1, 1]} : vector<64x128xf32> to vector<8x128xf32>
    %92 = arith.addf %90, %91 : vector<8x128xf32>
    %cst_22 = arith.constant 0.000000e+00 : f32
    %93 = vector.broadcast %cst_22 : f32 to vector<8x128xf32>
    %94 = arith.subf %93, %92 : vector<8x128xf32>
    %95 = math.exp %94 : vector<8x128xf32>
    %cst_23 = arith.constant 1.000000e+00 : f32
    %96 = vector.broadcast %cst_23 : f32 to vector<8x128xf32>
    %97 = arith.addf %96, %95 : vector<8x128xf32>
    %98 = tpu.reciprocal %97 {approx = true} : vector<8x128xf32> -> vector<8x128xf32>
    %99 = math.tanh %92 : vector<8x128xf32>
    %100 = vector.extract_strided_slice %98 {offsets = [0, 0], sizes = [8, 32], strides = [1, 1]} : vector<8x128xf32> to vector<8x32xf32>
    %101 = vector.extract_strided_slice %98 {offsets = [0, 32], sizes = [8, 32], strides = [1, 1]} : vector<8x128xf32> to vector<8x32xf32>
    %102 = vector.extract_strided_slice %99 {offsets = [0, 64], sizes = [8, 32], strides = [1, 1]} : vector<8x128xf32> to vector<8x32xf32>
    %103 = vector.extract_strided_slice %98 {offsets = [0, 96], sizes = [8, 32], strides = [1, 1]} : vector<8x128xf32> to vector<8x32xf32>
    %104 = arith.mulf %101, %87 : vector<8x32xf32>
    %105 = arith.mulf %100, %102 : vector<8x32xf32>
    %106 = arith.addf %104, %105 : vector<8x32xf32>
    %107 = math.tanh %106 : vector<8x32xf32>
    %108 = arith.mulf %103, %107 : vector<8x32xf32>
    %cst_24 = arith.constant dense<0.000000e+00> : vector<8x128xf32>
    %109 = tpu.matmul %108, %11, %cst_24 {dimension_numbers = #tpu.dot_dimension_numbers<[1], [0], [0], [1], [0, 0, 1, 1], [], []>} : vector<8x32xf32>, vector<32x128xf32>, vector<8x128xf32> -> vector<8x128xf32>
    %110 = vector.extract_strided_slice %10 {offsets = [40, 0], sizes = [8, 128], strides = [1, 1]} : vector<64x128xf32> to vector<8x128xf32>
    %111 = arith.addf %109, %110 : vector<8x128xf32>
    %cst_25 = arith.constant 0.000000e+00 : f32
    %112 = vector.broadcast %cst_25 : f32 to vector<8x128xf32>
    %113 = arith.subf %112, %111 : vector<8x128xf32>
    %114 = math.exp %113 : vector<8x128xf32>
    %cst_26 = arith.constant 1.000000e+00 : f32
    %115 = vector.broadcast %cst_26 : f32 to vector<8x128xf32>
    %116 = arith.addf %115, %114 : vector<8x128xf32>
    %117 = tpu.reciprocal %116 {approx = true} : vector<8x128xf32> -> vector<8x128xf32>
    %118 = math.tanh %111 : vector<8x128xf32>
    %119 = vector.extract_strided_slice %117 {offsets = [0, 0], sizes = [8, 32], strides = [1, 1]} : vector<8x128xf32> to vector<8x32xf32>
    %120 = vector.extract_strided_slice %117 {offsets = [0, 32], sizes = [8, 32], strides = [1, 1]} : vector<8x128xf32> to vector<8x32xf32>
    %121 = vector.extract_strided_slice %118 {offsets = [0, 64], sizes = [8, 32], strides = [1, 1]} : vector<8x128xf32> to vector<8x32xf32>
    %122 = vector.extract_strided_slice %117 {offsets = [0, 96], sizes = [8, 32], strides = [1, 1]} : vector<8x128xf32> to vector<8x32xf32>
    %123 = arith.mulf %120, %106 : vector<8x32xf32>
    %124 = arith.mulf %119, %121 : vector<8x32xf32>
    %125 = arith.addf %123, %124 : vector<8x32xf32>
    %126 = math.tanh %125 : vector<8x32xf32>
    %127 = arith.mulf %122, %126 : vector<8x32xf32>
    %cst_27 = arith.constant dense<0.000000e+00> : vector<8x128xf32>
    %128 = tpu.matmul %127, %11, %cst_27 {dimension_numbers = #tpu.dot_dimension_numbers<[1], [0], [0], [1], [0, 0, 1, 1], [], []>} : vector<8x32xf32>, vector<32x128xf32>, vector<8x128xf32> -> vector<8x128xf32>
    %129 = vector.extract_strided_slice %10 {offsets = [48, 0], sizes = [8, 128], strides = [1, 1]} : vector<64x128xf32> to vector<8x128xf32>
    %130 = arith.addf %128, %129 : vector<8x128xf32>
    %cst_28 = arith.constant 0.000000e+00 : f32
    %131 = vector.broadcast %cst_28 : f32 to vector<8x128xf32>
    %132 = arith.subf %131, %130 : vector<8x128xf32>
    %133 = math.exp %132 : vector<8x128xf32>
    %cst_29 = arith.constant 1.000000e+00 : f32
    %134 = vector.broadcast %cst_29 : f32 to vector<8x128xf32>
    %135 = arith.addf %134, %133 : vector<8x128xf32>
    %136 = tpu.reciprocal %135 {approx = true} : vector<8x128xf32> -> vector<8x128xf32>
    %137 = math.tanh %130 : vector<8x128xf32>
    %138 = vector.extract_strided_slice %136 {offsets = [0, 0], sizes = [8, 32], strides = [1, 1]} : vector<8x128xf32> to vector<8x32xf32>
    %139 = vector.extract_strided_slice %136 {offsets = [0, 32], sizes = [8, 32], strides = [1, 1]} : vector<8x128xf32> to vector<8x32xf32>
    %140 = vector.extract_strided_slice %137 {offsets = [0, 64], sizes = [8, 32], strides = [1, 1]} : vector<8x128xf32> to vector<8x32xf32>
    %141 = vector.extract_strided_slice %136 {offsets = [0, 96], sizes = [8, 32], strides = [1, 1]} : vector<8x128xf32> to vector<8x32xf32>
    %142 = arith.mulf %139, %125 : vector<8x32xf32>
    %143 = arith.mulf %138, %140 : vector<8x32xf32>
    %144 = arith.addf %142, %143 : vector<8x32xf32>
    %145 = math.tanh %144 : vector<8x32xf32>
    %146 = arith.mulf %141, %145 : vector<8x32xf32>
    %cst_30 = arith.constant dense<0.000000e+00> : vector<8x128xf32>
    %147 = tpu.matmul %146, %11, %cst_30 {dimension_numbers = #tpu.dot_dimension_numbers<[1], [0], [0], [1], [0, 0, 1, 1], [], []>} : vector<8x32xf32>, vector<32x128xf32>, vector<8x128xf32> -> vector<8x128xf32>
    %148 = vector.extract_strided_slice %10 {offsets = [56, 0], sizes = [8, 128], strides = [1, 1]} : vector<64x128xf32> to vector<8x128xf32>
    %149 = arith.addf %147, %148 : vector<8x128xf32>
    %cst_31 = arith.constant 0.000000e+00 : f32
    %150 = vector.broadcast %cst_31 : f32 to vector<8x128xf32>
    %151 = arith.subf %150, %149 : vector<8x128xf32>
    %152 = math.exp %151 : vector<8x128xf32>
    %cst_32 = arith.constant 1.000000e+00 : f32
    %153 = vector.broadcast %cst_32 : f32 to vector<8x128xf32>
    %154 = arith.addf %153, %152 : vector<8x128xf32>
    %155 = tpu.reciprocal %154 {approx = true} : vector<8x128xf32> -> vector<8x128xf32>
    %156 = math.tanh %149 : vector<8x128xf32>
    %157 = vector.extract_strided_slice %155 {offsets = [0, 0], sizes = [8, 32], strides = [1, 1]} : vector<8x128xf32> to vector<8x32xf32>
    %158 = vector.extract_strided_slice %155 {offsets = [0, 32], sizes = [8, 32], strides = [1, 1]} : vector<8x128xf32> to vector<8x32xf32>
    %159 = vector.extract_strided_slice %156 {offsets = [0, 64], sizes = [8, 32], strides = [1, 1]} : vector<8x128xf32> to vector<8x32xf32>
    %160 = vector.extract_strided_slice %155 {offsets = [0, 96], sizes = [8, 32], strides = [1, 1]} : vector<8x128xf32> to vector<8x32xf32>
    %161 = arith.mulf %158, %144 : vector<8x32xf32>
    %162 = arith.mulf %157, %159 : vector<8x32xf32>
    %163 = arith.addf %161, %162 : vector<8x32xf32>
    %164 = math.tanh %163 : vector<8x32xf32>
    %165 = arith.mulf %160, %164 : vector<8x32xf32>
    %c0_33 = arith.constant 0 : index
    %c0_34 = arith.constant 0 : index
    %166 = vector.load %arg4[%c0_33, %c0_34] : memref<32x4xf32, #tpu.memory_space<vmem>>, vector<32x4xf32>
    %cst_35 = arith.constant dense<0.000000e+00> : vector<8x4xf32>
    %167 = tpu.matmul %165, %166, %cst_35 {dimension_numbers = #tpu.dot_dimension_numbers<[1], [0], [0], [1], [0, 0, 1, 1], [], []>} : vector<8x32xf32>, vector<32x4xf32>, vector<8x4xf32> -> vector<8x4xf32>
    %c0_36 = arith.constant 0 : index
    %c0_37 = arith.constant 0 : index
    %168 = vector.load %arg5[%c0_36, %c0_37] : memref<1x4xf32, #tpu.memory_space<vmem>>, vector<1x4xf32>
    %169 = vector.broadcast %168 : vector<1x4xf32> to vector<8x4xf32>
    %170 = arith.addf %167, %169 : vector<8x4xf32>
    %cst_38 = arith.constant dense<0xFF800000> : vector<8xf32>
    %171 = vector.multi_reduction <maximumf>, %170, %cst_38 [1] : vector<8x4xf32> to vector<8xf32>
    %172 = vector.shape_cast %171 : vector<8xf32> to vector<8x1xf32>
    %173 = vector.broadcast %172 : vector<8x1xf32> to vector<8x4xf32>
    %174 = arith.subf %170, %173 : vector<8x4xf32>
    %175 = math.exp %174 : vector<8x4xf32>
    %cst_39 = arith.constant dense<0.000000e+00> : vector<8xf32>
    %176 = vector.multi_reduction <add>, %175, %cst_39 [1] : vector<8x4xf32> to vector<8xf32>
    %177 = vector.shape_cast %176 : vector<8xf32> to vector<8x1xf32>
    %178 = math.log %177 : vector<8x1xf32>
    %179 = arith.addf %172, %178 : vector<8x1xf32>
    %180 = vector.broadcast %179 : vector<8x1xf32> to vector<8x4xf32>
    %181 = arith.subf %170, %180 : vector<8x4xf32>
    %c0_40 = arith.constant 0 : index
    %c0_41 = arith.constant 0 : index
    %182 = vector.load %arg6[%c0_40, %c0_41] : memref<8x4xf32, #tpu.memory_space<vmem>>, vector<8x4xf32>
    tpu.vector_store %arg6[%c0_40, %c0_41], %181 {strides = array<i32>} : memref<8x4xf32, #tpu.memory_space<vmem>>, vector<8x4xf32>,
    return
  }
}

</mosaic_0001>

<bundles_post_ra>
// kernel: tpu_custom_call.1
= control target key start
LH: loop header
LB: loop body
LE: loop exit
PB: predicated region body
PF: predicated region fallthrough
CT: control target
= control target key end

     0   :  { %11 = vsyncpa [#allocation3], 0  ;;  %s1896_s21 = smov [#allocation2]   ;;  %s2206_s0 = inlined_call_operand.vmem [shape: s32[64,1], index: 0, kind: input, shape index: {}]   ;;  %s2207_s1 = inlined_call_operand.hbm [shape: f32[512,128], index: 1, kind: input, shape index: {}]   ;;  %s2208_s2 = inlined_call_operand.vmem [shape: f32[32,128], index: 2, kind: input, shape index: {}]   ;;  %s2209_s3 = inlined_call_operand.vmem [shape: f32[1,128], index: 3, kind: input, shape index: {}]   ;;  %s2210_s4 = inlined_call_operand.vmem [shape: f32[32,4], index: 4, kind: input, shape index: {}]   ;;  %s2211_s5 = inlined_call_operand.vmem [shape: f32[1,4], index: 5, kind: input, shape index: {}]   ;;  %s2212_s6 = inlined_call_operand.vmem [shape: f32[8,4], index: 6, kind: output, shape index: {}]  }
   0x1   :  { %s19_s22 = sshll.u32 %s1896_s21, 4  ;;  %s1872_s25 = scalar_lea.hbm %s2207_s1, 8192  ;;  %s20_s22 = int_to_ptr.vmem [resolvable:$true] %s19_s22 }
   0x2   :  { %p1873_p0 = scmp.ne.s32.totalorder %s2207_s1, %s1872_s25  ;;  %p1876_p1 = scmp.lt.u32.totalorder %s1872_s25, %s2207_s1 }
   0x4   :  { %p1878_p2 = pnand %p1876_p1, %p1873_p0 }
   0x6   :  { %1881 = shalt.err (!%p1878_p2)
}
   0x7   :  { %s1882_s30 = scalar_lea.vmem %s20_s22, 8192  ;;  %p1887_p4 = scmp.lt.s32.totalorder %s20_s22, %s20_s22 }
   0x8   :  { %p1883_p3 = scmp.ne.s32.totalorder %s20_s22, %s1882_s30  ;;  %p1888_p5 = scmp.lt.s32.totalorder %s1882_s30, %s1882_s30 }
   0xa   :  { %p1889_p6 = por %p1888_p5, %p1887_p4 }
   0xc   :  { %p1890_p7 = pnand %p1889_p6, %p1883_p3 }
   0xe   :  { %1893 = shalt.err (!%p1890_p7)
}
   0xf   :  { %s1897_s7 = smov 128   ;;  %s1898_s8 = smov 8  }
  0x10   :  { %25 = dma.hbm_to_vmem [thread:$0]  %s2207_s1, 8192, %s20_s22, [#allocation3], %s1897_s7, %s1897_s7, %s1898_s8  }
  0x11   :  { %1894 = dma.done.wait [#allocation3], 8192  }
  0x12   :  { %1895 = vsyncadd [#allocation3], 4294959104  ;;  %v1899_v0 = vmov 0   ;;  %v39_v1 = vld [vmem:[%s2206_s0 + $0x10] sm:$0xff]  ;;  %v37_v2 = vld [vmem:[%s2206_s0] sm:$0xff]  ;;  %s1905_s10 = smov 32  }
  0x13   :  { %1803 = vset.pattern.permute.xlu1 %v1899_v0  ;;  %1802 = vset.pattern.permute.xlu0 %v1899_v0  ;;  %v40_v3 = vld [vmem:[%s2206_s0 + $0x18] sm:$0xff]  ;;  %v38_v4 = vld [vmem:[%s2206_s0 + $0x8] sm:$0xff]  ;;  %v186_v5 = vld [vmem:[#allocation2 + $0x80] sm:$0xff] }
  0x14   :  { %57 = vperm.xlu1 %1803, %v39_v1   ;;  %51 = vperm.xlu0 %1802, %v37_v2   ;;  %v187_v6 = vld [vmem:[#allocation2 + $0x88] sm:$0xff]  ;;  %v170_v7 = vld [vmem:[#allocation2] sm:$0xff]  ;;  %v188_v18 = vld [vmem:[#allocation2 + $0x90] sm:$0xff] }
  0x15   :  { %v171_v8 = vld [vmem:[#allocation2 + $0x8] sm:$0xff]  ;;  %v41_v10 = vld [vmem:[%s2206_s0 + $0x20] sm:$0xff]  ;;  %v1674_v11 = vpack.c.bf16 %v187_v6, %v186_v5  ;;  %v189_v19 = vld [vmem:[#allocation2 + $0x98] sm:$0xff] }
  0x16   :  { %v42_v9 = vld [vmem:[%s2206_s0 + $0x28] sm:$0xff]  ;;  %v1676_v12 = vpack.c.bf16 %v171_v8, %v170_v7  ;;  %v218_v13 = vld [vmem:[#allocation2 + $0x180] sm:$0xff]  ;;  %v1678_v21 = vpack.c.bf16 %v189_v19, %v188_v18  ;;  %v172_v22 = vld [vmem:[#allocation2 + $0x10] sm:$0xff] }
  0x17   :  { %v219_v14 = vld [vmem:[#allocation2 + $0x188] sm:$0xff]  ;;  %v202_v15 = vld [vmem:[#allocation2 + $0x100] sm:$0xff]  ;;  %1675 = vmatprep.subr.bf16.mxu0 %v1674_v11  ;;  %v173_v23 = vld [vmem:[#allocation2 + $0x18] sm:$0xff] }
  0x18   :  { %60 = vperm.xlu1 %1803, %v40_v3   ;;  %54 = vperm.xlu0 %1802, %v38_v4   ;;  %v1706_v16 = vpack.c.bf16 %v219_v14, %v218_v13  ;;  %v203_v17 = vld [vmem:[#allocation2 + $0x108] sm:$0xff]  ;;  %v220_v24 = vld [vmem:[#allocation2 + $0x190] sm:$0xff]  ;;  %v1680_v25 = vpack.c.bf16 %v173_v23, %v172_v22  ;;  %v221_v26 = vld [vmem:[#allocation2 + $0x198] sm:$0xff] }
  0x19   :  { %v1708_v20 = vpack.c.bf16 %v203_v17, %v202_v15  ;;  %1677 = vmatpush3.bf16.msra.mxu0 %v1676_v12  ;;  %v204_v27 = vld [vmem:[#allocation2 + $0x110] sm:$0xff]  ;;  %v205_v28 = vld [vmem:[#allocation2 + $0x118] sm:$0xff]  ;;  %v1710_v31 = vpack.c.bf16 %v221_v26, %v220_v24  ;;  %v190_v33 = vld [vmem:[#allocation2 + $0xa0] sm:$0xff] }
  0x1a   :  { %1707 = vmatprep.subr.bf16.mxu1 %v1706_v16  ;;  %v44_v29 = vld [vmem:[%s2206_s0 + $0x38] sm:$0xff]  ;;  %v43_v30 = vld [vmem:[%s2206_s0 + $0x30] sm:$0xff]  ;;  %1679 = vmatprep.subr.bf16.mxu0 %v1678_v21  ;;  %v1712_v32 = vpack.c.bf16 %v205_v28, %v204_v27  ;;  %v191_v34 = vld [vmem:[#allocation2 + $0xa8] sm:$0xff] }
  0x1b   :  { %1709 = vmatpush3.bf16.msra.mxu1 %v1708_v20  ;;  %v174_v35 = vld [vmem:[#allocation2 + $0x20] sm:$0xff]  ;;  %v1682_v36 = vpack.c.bf16 %v191_v34, %v190_v33  ;;  %v175_v37 = vld [vmem:[#allocation2 + $0x28] sm:$0xff]  ;;  %v192_v43 = vld [vmem:[#allocation2 + $0xb0] sm:$0xff] }
  0x1c   :  { %66 = vperm.xlu1 %1803, %v42_v9   ;;  %63 = vperm.xlu0 %1802, %v41_v10   ;;  %v222_v38 = vld [vmem:[#allocation2 + $0x1a0] sm:$0xff]  ;;  %v223_v39 = vld [vmem:[#allocation2 + $0x1a8] sm:$0xff]  ;;  %v1684_v44 = vpack.c.bf16 %v175_v37, %v174_v35  ;;  %v193_v45 = vld [vmem:[#allocation2 + $0xb8] sm:$0xff] }
  0x1d   :  { %1711 = vmatprep.subr.bf16.mxu1 %v1710_v31  ;;  %v1714_v40 = vpack.c.bf16 %v223_v39, %v222_v38  ;;  %v206_v41 = vld [vmem:[#allocation2 + $0x120] sm:$0xff]  ;;  %v207_v42 = vld [vmem:[#allocation2 + $0x128] sm:$0xff]  ;;  %1681 = vmatpush3.bf16.msra.mxu0 %v1680_v25  ;;  %v176_v46 = vld [vmem:[#allocation2 + $0x30] sm:$0xff]  ;;  %v1686_v49 = vpack.c.bf16 %v193_v45, %v192_v43 }
  0x1e   :  { %v177_v47 = vld [vmem:[#allocation2 + $0x38] sm:$0xff]  ;;  %1683 = vmatprep.subr.bf16.mxu0 %v1682_v36  ;;  %v1716_v48 = vpack.c.bf16 %v207_v42, %v206_v41  ;;  %v224_v50 = vld [vmem:[#allocation2 + $0x1b0] sm:$0xff]  ;;  %v194_v55 = vld [vmem:[#allocation2 + $0xc0] sm:$0xff]  ;;  %v1900_v41 = vmov 0.0|0.0   ;;  %v45_v42 = vlaneseq }
  0x1f   :  { %1713 = vmatpush3.bf16.msra.mxu1 %v1712_v32  ;;  %v225_v51 = vld [vmem:[#allocation2 + $0x1b8] sm:$0xff]  ;;  %v208_v52 = vld [vmem:[#allocation2 + $0x130] sm:$0xff]  ;;  %v195_v56 = vld [vmem:[#allocation2 + $0xc8] sm:$0xff]  ;;  %v1688_v58 = vpack.c.bf16 %v177_v47, %v176_v46 }
  0x20   :  { %72 = vperm.xlu1 %1803, %v44_v29   ;;  %69 = vperm.xlu0 %1802, %v43_v30   ;;  %v1718_v53 = vpack.c.bf16 %v225_v51, %v224_v50  ;;  %v209_v54 = vld [vmem:[#allocation2 + $0x138] sm:$0xff]  ;;  %v226_v57 = vld [vmem:[#allocation2 + $0x1c0] sm:$0xff]  ;;  %v227_v59 = vld [vmem:[#allocation2 + $0x1c8] sm:$0xff]  ;;  %v1690_v61 = vpack.c.bf16 %v195_v56, %v194_v55  ;;  %v1979_v43 = vand.u32 127, %v45_v42 }
  0x21   :  { %1715 = vmatprep.subr.bf16.mxu1 %v1714_v40  ;;  %1685 = vmatpush3.bf16.msra.mxu0 %v1684_v44  ;;  %v1720_v60 = vpack.c.bf16 %v209_v54, %v208_v52  ;;  %v178_v62 = vld [vmem:[#allocation2 + $0x40] sm:$0xff]  ;;  %v179_v63 = vld [vmem:[#allocation2 + $0x48] sm:$0xff]  ;;  %v1722_v1 = vpack.c.bf16 %v227_v59, %v226_v57  ;;  %v196_v3 = vld [vmem:[#allocation2 + $0xd0] sm:$0xff] }
  0x22   :  { %1687 = vmatprep.subr.bf16.mxu0 %v1686_v49  ;;  %v210_v0 = vld [vmem:[#allocation2 + $0x140] sm:$0xff]  ;;  %v211_v2 = vld [vmem:[#allocation2 + $0x148] sm:$0xff]  ;;  %v197_v4 = vld [vmem:[#allocation2 + $0xd8] sm:$0xff]  ;;  %v1692_v7 = vpack.c.bf16 %v179_v63, %v178_v62  ;;  %v1982_v44 = vadd.s32 128, %v1979_v43  ;;  %v1985_v45 = vadd.s32 384, %v1979_v43  ;;  %v1988_v46 = vadd.s32 256, %v1979_v43 }
  0x23   :  { %1717 = vmatpush3.bf16.msra.mxu1 %v1716_v48  ;;  %v228_v5 = vld [vmem:[#allocation2 + $0x1d0] sm:$0xff]  ;;  %v229_v6 = vld [vmem:[#allocation2 + $0x1d8] sm:$0xff]  ;;  %v1724_v8 = vpack.c.bf16 %v211_v2, %v210_v0  ;;  %v1694_v9 = vpack.c.bf16 %v197_v4, %v196_v3  ;;  %v198_v15 = vld [vmem:[#allocation2 + $0xe0] sm:$0xff]  ;;  %v1903_v62 = vmov 0.0  }
  0x24   :  { %1719 = vmatprep.subr.bf16.mxu1 %v1718_v53  ;;  %v180_v10 = vld [vmem:[#allocation2 + $0x50] sm:$0xff]  ;;  %v181_v11 = vld [vmem:[#allocation2 + $0x58] sm:$0xff]  ;;  %v1726_v13 = vpack.c.bf16 %v229_v6, %v228_v5  ;;  %v199_v16 = vld [vmem:[#allocation2 + $0xe8] sm:$0xff]  ;;  %v1901_v53 = vmov 1.0  }
  0x25   :  { %1689 = vmatpush3.bf16.msra.mxu0 %v1688_v58  ;;  %v212_v12 = vld [vmem:[#allocation2 + $0x150] sm:$0xff]  ;;  %v213_v14 = vld [vmem:[#allocation2 + $0x158] sm:$0xff]  ;;  %v230_v17 = vld [vmem:[#allocation2 + $0x1e0] sm:$0xff]  ;;  %v1696_v19 = vpack.c.bf16 %v181_v11, %v180_v10  ;;  %v1698_v21 = vpack.c.bf16 %v199_v16, %v198_v15 }
  0x26   :  { %1691 = vmatprep.subr.bf16.mxu0 %v1690_v61  ;;  %v231_v18 = vld [vmem:[#allocation2 + $0x1e8] sm:$0xff]  ;;  %v1728_v20 = vpack.c.bf16 %v213_v14, %v212_v12  ;;  %v182_v22 = vld [vmem:[#allocation2 + $0x60] sm:$0xff]  ;;  %v200_v27 = vld [vmem:[#allocation2 + $0xf0] sm:$0xff] }
  0x27   :  { %1721 = vmatpush3.bf16.msra.mxu1 %v1720_v60  ;;  %v183_v23 = vld [vmem:[#allocation2 + $0x68] sm:$0xff]  ;;  %v214_v24 = vld [vmem:[#allocation2 + $0x160] sm:$0xff]  ;;  %v1730_v25 = vpack.c.bf16 %v231_v18, %v230_v17  ;;  %v201_v28 = vld [vmem:[#allocation2 + $0xf8] sm:$0xff] }
  0x28   :  { %1723 = vmatprep.subr.bf16.mxu1 %v1722_v1  ;;  %v215_v26 = vld [vmem:[#allocation2 + $0x168] sm:$0xff]  ;;  %v232_v29 = vld [vmem:[#allocation2 + $0x1f0] sm:$0xff]  ;;  %v233_v30 = vld [vmem:[#allocation2 + $0x1f8] sm:$0xff]  ;;  %v1700_v31 = vpack.c.bf16 %v183_v23, %v182_v22  ;;  %v1702_v33 = vpack.c.bf16 %v201_v28, %v200_v27 }
  0x29   :  { %1693 = vmatpush3.bf16.msra.mxu0 %v1692_v7  ;;  %v1732_v32 = vpack.c.bf16 %v215_v26, %v214_v24  ;;  %v184_v34 = vld [vmem:[#allocation2 + $0x70] sm:$0xff]  ;;  %v185_v35 = vld [vmem:[#allocation2 + $0x78] sm:$0xff]  ;;  %v1734_v36 = vpack.c.bf16 %v233_v30, %v232_v29  ;;  %v451_v47 = vld [vmem:[%s2208_s2] sm:$0xff] }
  0x2a   :  { %1695 = vmatprep.subr.bf16.mxu0 %v1694_v9  ;;  %v216_v37 = vld [vmem:[#allocation2 + $0x170] sm:$0xff]  ;;  %v217_v38 = vld [vmem:[#allocation2 + $0x178] sm:$0xff]  ;;  %v1704_v39 = vpack.c.bf16 %v185_v35, %v184_v34  ;;  %v452_v48 = vld [vmem:[%s2208_s2 + $0x8] sm:$0xff] }
  0x2b   :  { %1725 = vmatpush3.bf16.msra.mxu1 %v1724_v8  ;;  %v1736_v40 = vpack.c.bf16 %v217_v38, %v216_v37  ;;  %v1996_v50 = vpack.c.bf16 %v452_v48, %v451_v47  ;;  %v453_v51 = vld [vmem:[%s2208_s2 + $0x10] sm:$0xff]  ;;  %v454_v52 = vld [vmem:[%s2208_s2 + $0x18] sm:$0xff]  ;;  %v1376_v1 = vld [vmem:[%s2209_s3] ss:$0 sm:$0xff]  ;;  %s1904_s3 = smov 64  }
  0x2c   :  { %1727 = vmatprep.subr.bf16.mxu1 %v1726_v13  ;;  %v2015_v56 = vpack.c.bf16 %v454_v52, %v453_v51 }
  0x2d   :  { %1697 = vmatpush3.bf16.msra.mxu0 %v1696_v19 }
  0x2e   :  { %1699 = vmatprep.subr.bf16.mxu0 %v1698_v21 }
  0x2f   :  { %1729 = vmatpush3.bf16.msra.mxu1 %v1728_v20 }
  0x30   :  { %1731 = vmatprep.subr.bf16.mxu1 %v1730_v25 }
  0x31   :  { %1701 = vmatpush3.bf16.msra.mxu0 %v1700_v31 }
  0x32   :  { %1703 = vmatprep.subr.bf16.mxu0 %v1702_v33 }
  0x33   :  { %1733 = vmatpush3.bf16.msra.mxu1 %v1732_v32 }
  0x34   :  { %1735 = vmatprep.subr.bf16.mxu1 %v1734_v36 }
  0x35   :  { %1705 = vmatpush3.bf16.msra.mxu0 %v1704_v39 }
  0x36   :  { %1738 = vmatprep.subr.bf16.mxu0 %v1900_v41 }
  0x37   :  { %1737 = vmatpush3.bf16.msra.mxu1 %v1736_v40 }
  0x38   :  { %1744 = vmatprep.subr.bf16.mxu1 %v1900_v41 }
  0x93   :  { %v52_v49 = vpop.permute.xlu0 %51  ;;  %v58_v54 = vpop.permute.xlu1 %57 }
  0x94   :  { %vm75_vm0 = vcmp.eq.s32.totalorder %v1982_v44, %v52_v49  ;;  %vm77_vm1 = vcmp.eq.s32.totalorder %v1985_v45, %v52_v49  ;;  %vm74_vm2 = vcmp.eq.s32.totalorder %v1979_v43, %v52_v49  ;;  %vm76_vm3 = vcmp.eq.s32.totalorder %v1988_v46, %v52_v49 }
  0x95   :  { %1377 = vmatprep.mubr.msk.f32.mxu0 %vm75_vm0, %v1901_v53  ;;  %1393 = vmatprep.mubr.msk.f32.mxu1 %vm77_vm1, %v1901_v53  ;;  %vm83_vm4 = vcmp.eq.s32.totalorder %v1982_v44, %v58_v54  ;;  %vm85_vm5 = vcmp.eq.s32.totalorder %v1985_v45, %v58_v54  ;;  %vm82_vm10 = vcmp.eq.s32.totalorder %v1979_v43, %v58_v54 }
  0x96   :  { %1378 = vmatmul.mubr.msk.f32.vlgmr.msra.gmra.mrb[0].mxu0 %vm74_vm2, %v1901_v53  ;;  %1394 = vmatmul.mubr.msk.f32.vlgmr.msra.gmra.mrb[0].mxu1 %vm76_vm3, %v1901_v53  ;;  %vm84_vm11 = vcmp.eq.s32.totalorder %v1988_v46, %v58_v54 }
  0x97   :  { %1740 = vmatpush3.bf16.msra.mxu0 %v1996_v50  ;;  %v55_v55 = vpop.permute.xlu0 %54  ;;  %1746 = vmatpush3.bf16.msra.mxu1 %v1996_v50  ;;  %v61_v57 = vpop.permute.xlu1 %60 }
  0x98   :  { %vm79_vm6 = vcmp.eq.s32.totalorder %v1982_v44, %v55_v55  ;;  %vm81_vm7 = vcmp.eq.s32.totalorder %v1985_v45, %v55_v55  ;;  %vm78_vm8 = vcmp.eq.s32.totalorder %v1979_v43, %v55_v55  ;;  %vm80_vm9 = vcmp.eq.s32.totalorder %v1988_v46, %v55_v55  ;;  %1741 = vmatprep.subr.bf16.mxu0 %v1900_v41 }
  0x99   :  { %1379 = vmatprep.mubr.msk.f32.mxu0 %vm79_vm6, %v1901_v53  ;;  %1395 = vmatprep.mubr.msk.f32.mxu1 %vm81_vm7, %v1901_v53  ;;  %vm87_vm12 = vcmp.eq.s32.totalorder %v1982_v44, %v61_v57  ;;  %vm89_vm13 = vcmp.eq.s32.totalorder %v1985_v45, %v61_v57  ;;  %vm86_vm14 = vcmp.eq.s32.totalorder %v1979_v43, %v61_v57 }
  0x9a   :  { %1380 = vmatmul.mubr.msk.f32.gmra.mrb[2].mxu0 %vm78_vm8, %v1901_v53  ;;  %1396 = vmatmul.mubr.msk.f32.gmra.mrb[2].mxu1 %vm80_vm9, %v1901_v53  ;;  %vm88_vm15 = vcmp.eq.s32.totalorder %v1988_v46, %v61_v57 }
  0x9b   :  { %1381 = vmatprep.mubr.msk.f32.mxu0 %vm83_vm4, %v1901_v53  ;;  %1397 = vmatprep.mubr.msk.f32.mxu1 %vm85_vm5, %v1901_v53  ;;  %v64_v58 = vpop.permute.xlu0 %63  ;;  %v67_v59 = vpop.permute.xlu1 %66 }
  0x9c   :  { %1743 = vmatpush3.bf16.msra.mxu0 %v2015_v56  ;;  %1747 = vmatprep.subr.bf16.mxu1 %v1900_v41  ;;  %vm91_vm0 = vcmp.eq.s32.totalorder %v1982_v44, %v64_v58  ;;  %vm93_vm1 = vcmp.eq.s32.totalorder %v1985_v45, %v64_v58  ;;  %vm90_vm2 = vcmp.eq.s32.totalorder %v1979_v43, %v64_v58 }
  0x9d   :  { %1749 = vmatpush3.bf16.msra.mxu1 %v2015_v56  ;;  %1750 = vmatprep.subr.bf16.mxu0 %v1900_v41  ;;  %vm92_vm3 = vcmp.eq.s32.totalorder %v1988_v46, %v64_v58  ;;  %vm95_vm4 = vcmp.eq.s32.totalorder %v1982_v44, %v67_v59  ;;  %vm97_vm5 = vcmp.eq.s32.totalorder %v1985_v45, %v67_v59 }
  0x9e   :  { %1382 = vmatmul.mubr.msk.f32.gmra.mrb[4].mxu0 %vm82_vm10, %v1901_v53  ;;  %1398 = vmatmul.mubr.msk.f32.gmra.mrb[4].mxu1 %vm84_vm11, %v1901_v53  ;;  %vm94_vm6 = vcmp.eq.s32.totalorder %v1979_v43, %v67_v59  ;;  %vm96_vm7 = vcmp.eq.s32.totalorder %v1988_v46, %v67_v59 }
  0x9f   :  { %1383 = vmatprep.mubr.msk.f32.mxu0 %vm87_vm12, %v1901_v53  ;;  %1399 = vmatprep.mubr.msk.f32.mxu1 %vm89_vm13, %v1901_v53  ;;  %v70_v60 = vpop.permute.xlu0 %69  ;;  %v73_v61 = vpop.permute.xlu1 %72 }
  0xa0   :  { %1756 = vmatprep.subr.bf16.mxu1 %v1900_v41  ;;  %vm99_vm8 = vcmp.eq.s32.totalorder %v1982_v44, %v70_v60  ;;  %vm101_vm9 = vcmp.eq.s32.totalorder %v1985_v45, %v70_v60  ;;  %vm98_vm10 = vcmp.eq.s32.totalorder %v1979_v43, %v70_v60  ;;  %vm100_vm11 = vcmp.eq.s32.totalorder %v1988_v46, %v70_v60 }
  0xa1   :  { %vm103_vm12 = vcmp.eq.s32.totalorder %v1982_v44, %v73_v61  ;;  %vm105_vm13 = vcmp.eq.s32.totalorder %v1985_v45, %v73_v61 }
  0xa2   :  { %1384 = vmatmul.mubr.msk.f32.gmra.mrb[6].mxu0 %vm86_vm14, %v1901_v53  ;;  %1400 = vmatmul.mubr.msk.f32.gmra.mrb[6].mxu1 %vm88_vm15, %v1901_v53  ;;  %vm102_vm14 = vcmp.eq.s32.totalorder %v1979_v43, %v73_v61  ;;  %vm104_vm15 = vcmp.eq.s32.totalorder %v1988_v46, %v73_v61 }
  0xa3   :  { %1385 = vmatprep.mubr.msk.f32.mxu0 %vm91_vm0, %v1901_v53  ;;  %1401 = vmatprep.mubr.msk.f32.mxu1 %vm93_vm1, %v1901_v53  ;;  %vm1902_vm0 = vmmov 0   ;;  %vm455_vm1 = vcmask 261120  }
  0xa6   :  { %1386 = vmatmul.mubr.msk.f32.gmra.mrb[8].mxu0 %vm90_vm2, %v1901_v53  ;;  %1402 = vmatmul.mubr.msk.f32.gmra.mrb[8].mxu1 %vm92_vm3, %v1901_v53  ;;  %vm1324_vm2 = vcmask 31744  }
  0xa7   :  { %1387 = vmatprep.mubr.msk.f32.mxu0 %vm95_vm4, %v1901_v53  ;;  %1403 = vmatprep.mubr.msk.f32.mxu1 %vm97_vm5, %v1901_v53 }
  0xaa   :  { %1388 = vmatmul.mubr.msk.f32.gmra.mrb[10].mxu0 %vm94_vm6, %v1901_v53  ;;  %1404 = vmatmul.mubr.msk.f32.gmra.mrb[10].mxu1 %vm96_vm7, %v1901_v53 }
  0xab   :  { %1389 = vmatprep.mubr.msk.f32.mxu0 %vm99_vm8, %v1901_v53  ;;  %1405 = vmatprep.mubr.msk.f32.mxu1 %vm101_vm9, %v1901_v53 }
  0xae   :  { %1390 = vmatmul.mubr.msk.f32.gmra.mrb[12].mxu0 %vm98_vm10, %v1901_v53  ;;  %1406 = vmatmul.mubr.msk.f32.gmra.mrb[12].mxu1 %vm100_vm11, %v1901_v53 }
  0xaf   :  { %1391 = vmatprep.mubr.msk.f32.mxu0 %vm103_vm12, %v1901_v53  ;;  %1407 = vmatprep.mubr.msk.f32.mxu1 %vm105_vm13, %v1901_v53 }
  0xb2   :  { %1392 = vmatmul.mubr.msk.f32.gmra.mrb[14].mxu0 %vm102_vm14, %v1901_v53  ;;  %1408 = vmatmul.mubr.msk.f32.gmra.mrb[14].mxu1 %vm104_vm15, %v1901_v53 }
  0xb3   :  { %1583 = vmatprep.mubr.msk.f32.mxu0 %vm1902_vm0, %v1903_v62  ;;  %1594 = vmatprep.mubr.msk.f32.mxu1 %vm1902_vm0, %v1903_v62 }
  0xb6   :  { %1584 = vmatmul.mubr.f32.vlgmr.msra.gmra.mrb[16].mxu0 %v1903_v62 }
  0xb7   :  { %1752 = vmatpush3.bf16.msra.mxu0 %v1996_v50  ;;  %1605 = vmatprep.mubr.msk.f32.mxu0 %vm1902_vm0, %v1903_v62 }
  0xb8   :  { %1753 = vmatprep.subr.bf16.mxu0 %v1900_v41 }
  0xbb   :  { %1755 = vmatpush3.bf16.msra.mxu0 %v2015_v56 }
  0xbc   :  { %1762 = vmatprep.subr.bf16.mxu0 %v1900_v41 }
 0x169   :  { %v1450_v63 = vpop.f32.mrb[0].mxu0  ;;  %v1506_v0 = vpop.f32.mrb[0].mxu1 }
 0x16a   :  { %v1451_v2 = vpop.f32.mrb[1].mxu0  ;;  %v1507_v3 = vpop.f32.mrb[1].mxu1 }
 0x16b   :  { %v1452_v4 = vadd.f32 %v1451_v2, %v1450_v63  ;;  %v1508_v5 = vadd.f32 %v1507_v3, %v1506_v0 }
 0x16d   :  { %v308_v6 = vadd.f32 %v1452_v4, %v1376_v1  ;;  %v1453_v7 = vpop.f32.mrb[2].mxu0  ;;  %v1509_v8 = vpop.f32.mrb[2].mxu1 }
 0x16e   :  { %v1454_v9 = vpop.f32.mrb[3].mxu0  ;;  %v1510_v10 = vpop.f32.mrb[3].mxu1 }
 0x16f   :  { %v1455_v11 = vadd.f32 %v1454_v9, %v1453_v7  ;;  %v1511_v12 = vadd.f32 %v1510_v10, %v1509_v8  ;;  %v413_v13 = vadd.f32 %v1508_v5, %v308_v6 }
 0x171   :  { %v313_v14 = vadd.f32 %v1455_v11, %v1376_v1  ;;  %v1456_v15 = vpop.f32.mrb[4].mxu0  ;;  %v1512_v16 = vpop.f32.mrb[4].mxu1 }
 0x172   :  { %v1457_v17 = vpop.f32.mrb[5].mxu0  ;;  %v1513_v18 = vpop.f32.mrb[5].mxu1 }
 0x173   :  { %v1458_v19 = vadd.f32 %v1457_v17, %v1456_v15  ;;  %v1514_v20 = vadd.f32 %v1513_v18, %v1512_v16  ;;  %v2092_v21 = vadd.f32 %v1511_v12, %v313_v14 }
 0x175   :  { %v318_v22 = vadd.f32 %v1458_v19, %v1376_v1  ;;  %v1459_v23 = vpop.f32.mrb[6].mxu0  ;;  %v1515_v24 = vpop.f32.mrb[6].mxu1 }
 0x176   :  { %v1460_v25 = vpop.f32.mrb[7].mxu0  ;;  %v1516_v26 = vpop.f32.mrb[7].mxu1 }
 0x177   :  { %v1461_v27 = vadd.f32 %v1460_v25, %v1459_v23  ;;  %v1517_v28 = vadd.f32 %v1516_v26, %v1515_v24  ;;  %v2094_v29 = vadd.f32 %v1514_v20, %v318_v22 }
 0x179   :  { %v323_v30 = vadd.f32 %v1461_v27, %v1376_v1  ;;  %v1462_v31 = vpop.f32.mrb[8].mxu0  ;;  %v1518_v32 = vpop.f32.mrb[8].mxu1 }
 0x17a   :  { %v1463_v33 = vpop.f32.mrb[9].mxu0  ;;  %v1519_v34 = vpop.f32.mrb[9].mxu1 }
 0x17b   :  { %v1464_v35 = vadd.f32 %v1463_v33, %v1462_v31  ;;  %v1520_v36 = vadd.f32 %v1519_v34, %v1518_v32  ;;  %v2096_v37 = vadd.f32 %v1517_v28, %v323_v30 }
 0x17d   :  { %v328_v38 = vadd.f32 %v1464_v35, %v1376_v1  ;;  %v1465_v39 = vpop.f32.mrb[10].mxu0  ;;  %v1521_v40 = vpop.f32.mrb[10].mxu1 }
 0x17e   :  { %v1466_v42 = vpop.f32.mrb[11].mxu0  ;;  %v1522_v43 = vpop.f32.mrb[11].mxu1 }
 0x17f   :  { %v1467_v44 = vadd.f32 %v1466_v42, %v1465_v39  ;;  %v1523_v45 = vadd.f32 %v1522_v43, %v1521_v40  ;;  %v2098_v46 = vadd.f32 %v1520_v36, %v328_v38 }
 0x181   :  { %v333_v47 = vadd.f32 %v1467_v44, %v1376_v1  ;;  %v1468_v48 = vpop.f32.mrb[12].mxu0  ;;  %v1524_v49 = vpop.f32.mrb[12].mxu1 }
 0x182   :  { %v1469_v51 = vpop.f32.mrb[13].mxu0  ;;  %v1525_v52 = vpop.f32.mrb[13].mxu1 }
 0x183   :  { %v1470_v53 = vadd.f32 %v1469_v51, %v1468_v48  ;;  %v1526_v54 = vadd.f32 %v1525_v52, %v1524_v49  ;;  %v2100_v55 = vadd.f32 %v1523_v45, %v333_v47 }
 0x185   :  { %v338_v57 = vadd.f32 %v1470_v53, %v1376_v1  ;;  %v1471_v58 = vpop.f32.mrb[14].mxu0  ;;  %v1527_v59 = vpop.f32.mrb[14].mxu1 }
 0x186   :  { %v1472_v60 = vpop.f32.mrb[15].mxu0  ;;  %v1528_v61 = vpop.f32.mrb[15].mxu1 }
 0x187   :  { %v1473_v63 = vadd.f32 %v1472_v60, %v1471_v58  ;;  %v1529_v0 = vadd.f32 %v1528_v61, %v1527_v59  ;;  %v2102_v2 = vadd.f32 %v1526_v54, %v338_v57 }
 0x189   :  { %v343_v3 = vadd.f32 %v1473_v63, %v1376_v1  ;;  %v525_v4 = vpop.f32.mrb[16].mxu0 }
 0x18a   :  { %v526_v5 = vadd.f32 %v525_v4, %v413_v13  ;;  %v1585_v6 = vpop.f32.mrb[17].mxu0 }
 0x18b   :  { %v2104_v7 = vadd.f32 %v1529_v0, %v343_v3 }
 0x18c   :  { %1804 = vtanh.f32 %v526_v5  ;;  %v529_v9 = vsub.f32 0.0, %v526_v5 }
 0x18e   :  { %v530_v10 = vmul.f32 1.442695, %v529_v9 }
 0x190   :  { %1806 = vpow2.f32 %v530_v10 }
 0x196   :  { %v1805_v8 = vpop.eup %1804 }
 0x197   :  { %537 = vrot.lane.b32.xlu0 %v1805_v8, %s1904_s3 }
 0x19a   :  { %v1807_v11 = vpop.eup %1806 }
 0x19b   :  { %v532_v12 = vadd.f32 1.0, %v1807_v11 }
 0x19d   :  { %1808 = vrcp.f32 %v532_v12 }
 0x1a7   :  { %v1809_v14 = vpop.eup %1808 }
 0x1a8   :  { %v535_v1 = vmul.f32 0.0, %v1809_v14 }
 0x209   :  { %v538_v15 = vpop.permute.xlu0 %537 }
 0x20a   :  { %v540_v16 = vmul.f32 %v1809_v14, %v538_v15 }
 0x20c   :  { %542 = vrot.lane.b32.xlu1 %v540_v16, %s1905_s10 }
 0x27e   :  { %v543_v13 = vpop.permute.xlu1 %542 }
 0x27f   :  { %v545_v17 = vadd.f32 %v543_v13, %v535_v1 }
 0x281   :  { %1810 = vtanh.f32 %v545_v17 }
 0x28b   :  { %v1811_v18 = vpop.eup %1810 }
 0x28c   :  { %548 = vrot.lane.b32.xlu0 %v1811_v18, %s1904_s3 }
 0x2fe   :  { %v549_v19 = vpop.permute.xlu0 %548 }
 0x2ff   :  { %v551_v20 = vmul.f32 %v1809_v14, %v549_v19 }
 0x301   :  { %553 = vrot.lane.b32.xlu1 %v551_v20, %s1905_s10 }
 0x373   :  { %v554_v22 = vpop.permute.xlu1 %553 }
 0x374   :  { %1595 = vmatmul.mubr.msk.f32.vlgmr.msra.gmra.mrb[16].mxu1 %vm455_vm1, %v554_v22 }
 0x375   :  { %1758 = vmatpush3.bf16.msra.mxu1 %v1996_v50  ;;  %1616 = vmatprep.mubr.msk.f32.mxu1 %vm1902_vm0, %v1903_v62 }
 0x376   :  { %1759 = vmatprep.subr.bf16.mxu1 %v1900_v41 }
 0x379   :  { %1761 = vmatpush3.bf16.msra.mxu1 %v2015_v56 }
 0x37a   :  { %1768 = vmatprep.subr.bf16.mxu1 %v1900_v41 }
 0x447   :  { %v623_v23 = vpop.f32.mrb[16].mxu1 }
 0x448   :  { %v624_v24 = vadd.f32 %v623_v23, %v2092_v21  ;;  %v1596_v25 = vpop.f32.mrb[17].mxu1 }
 0x44a   :  { %1812 = vtanh.f32 %v624_v24  ;;  %v627_v27 = vsub.f32 0.0, %v624_v24 }
 0x44c   :  { %v628_v28 = vmul.f32 1.442695, %v627_v27 }
 0x44e   :  { %1814 = vpow2.f32 %v628_v28 }
 0x454   :  { %v1813_v26 = vpop.eup %1812 }
 0x455   :  { %635 = vrot.lane.b32.xlu0 %v1813_v26, %s1904_s3 }
 0x458   :  { %v1815_v30 = vpop.eup %1814 }
 0x459   :  { %v630_v31 = vadd.f32 1.0, %v1815_v30 }
 0x45b   :  { %1816 = vrcp.f32 %v630_v31 }
 0x465   :  { %v1817_v32 = vpop.eup %1816 }
 0x466   :  { %v633_v35 = vmul.f32 %v1817_v32, %v545_v17 }
 0x4c7   :  { %v636_v33 = vpop.permute.xlu0 %635 }
 0x4c8   :  { %v638_v34 = vmul.f32 %v1817_v32, %v636_v33 }
 0x4ca   :  { %640 = vrot.lane.b32.xlu1 %v638_v34, %s1905_s10 }
 0x53c   :  { %v641_v36 = vpop.permute.xlu1 %640 }
 0x53d   :  { %v643_v38 = vadd.f32 %v641_v36, %v633_v35 }
 0x53f   :  { %1818 = vtanh.f32 %v643_v38 }
 0x549   :  { %v1819_v21 = vpop.eup %1818 }
 0x54a   :  { %646 = vrot.lane.b32.xlu0 %v1819_v21, %s1904_s3 }
 0x5bc   :  { %v647_v39 = vpop.permute.xlu0 %646 }
 0x5bd   :  { %v649_v40 = vmul.f32 %v1817_v32, %v647_v39 }
 0x5bf   :  { %651 = vrot.lane.b32.xlu1 %v649_v40, %s1905_s10 }
 0x631   :  { %v652_v42 = vpop.permute.xlu1 %651 }
 0x632   :  { %1606 = vmatmul.mubr.msk.f32.vlgmr.msra.gmra.mrb[18].mxu0 %vm455_vm1, %v652_v42 }
 0x633   :  { %1764 = vmatpush3.bf16.msra.mxu0 %v1996_v50  ;;  %1627 = vmatprep.mubr.msk.f32.mxu0 %vm1902_vm0, %v1903_v62 }
 0x634   :  { %1765 = vmatprep.subr.bf16.mxu0 %v1900_v41 }
 0x637   :  { %1767 = vmatpush3.bf16.msra.mxu0 %v2015_v56 }
 0x638   :  { %1774 = vmatprep.subr.bf16.mxu0 %v1900_v41 }
 0x705   :  { %v721_v43 = vpop.f32.mrb[18].mxu0 }
 0x706   :  { %v722_v44 = vadd.f32 %v721_v43, %v2094_v29  ;;  %v1607_v45 = vpop.f32.mrb[19].mxu0 }
 0x708   :  { %1820 = vtanh.f32 %v722_v44  ;;  %v725_v48 = vsub.f32 0.0, %v722_v44 }
 0x70a   :  { %v726_v49 = vmul.f32 1.442695, %v725_v48 }
 0x70c   :  { %1822 = vpow2.f32 %v726_v49 }
 0x712   :  { %v1821_v47 = vpop.eup %1820 }
 0x713   :  { %733 = vrot.lane.b32.xlu0 %v1821_v47, %s1904_s3 }
 0x716   :  { %v1823_v51 = vpop.eup %1822 }
 0x717   :  { %v728_v52 = vadd.f32 1.0, %v1823_v51 }
 0x719   :  { %1824 = vrcp.f32 %v728_v52 }
 0x723   :  { %v1825_v53 = vpop.eup %1824 }
 0x724   :  { %v731_v58 = vmul.f32 %v1825_v53, %v643_v38 }
 0x785   :  { %v734_v54 = vpop.permute.xlu0 %733 }
 0x786   :  { %v736_v57 = vmul.f32 %v1825_v53, %v734_v54 }
 0x788   :  { %738 = vrot.lane.b32.xlu1 %v736_v57, %s1905_s10 }
 0x7fa   :  { %v739_v59 = vpop.permute.xlu1 %738 }
 0x7fb   :  { %v741_v60 = vadd.f32 %v739_v59, %v731_v58 }
 0x7fd   :  { %1826 = vtanh.f32 %v741_v60 }
 0x807   :  { %v1827_v29 = vpop.eup %1826 }
 0x808   :  { %744 = vrot.lane.b32.xlu0 %v1827_v29, %s1904_s3 }
 0x87a   :  { %v745_v61 = vpop.permute.xlu0 %744 }
 0x87b   :  { %v747_v63 = vmul.f32 %v1825_v53, %v745_v61 }
 0x87d   :  { %749 = vrot.lane.b32.xlu1 %v747_v63, %s1905_s10 }
 0x8ef   :  { %v750_v0 = vpop.permute.xlu1 %749 }
 0x8f0   :  { %1617 = vmatmul.mubr.msk.f32.vlgmr.msra.gmra.mrb[18].mxu1 %vm455_vm1, %v750_v0 }
 0x8f1   :  { %1770 = vmatpush3.bf16.msra.mxu1 %v1996_v50  ;;  %1638 = vmatprep.mubr.msk.f32.mxu1 %vm1902_vm0, %v1903_v62 }
 0x8f2   :  { %1771 = vmatprep.subr.bf16.mxu1 %v1900_v41 }
 0x8f5   :  { %1773 = vmatpush3.bf16.msra.mxu1 %v2015_v56 }
 0x8f6   :  { %1780 = vmatprep.subr.bf16.mxu1 %v1900_v41 }
 0x9c3   :  { %v819_v3 = vpop.f32.mrb[18].mxu1 }
 0x9c4   :  { %v820_v4 = vadd.f32 %v819_v3, %v2096_v37  ;;  %v1618_v5 = vpop.f32.mrb[19].mxu1 }
 0x9c6   :  { %1828 = vtanh.f32 %v820_v4  ;;  %v823_v8 = vsub.f32 0.0, %v820_v4 }
 0x9c8   :  { %v824_v9 = vmul.f32 1.442695, %v823_v8 }
 0x9ca   :  { %1830 = vpow2.f32 %v824_v9 }
 0x9d0   :  { %v1829_v6 = vpop.eup %1828 }
 0x9d1   :  { %831 = vrot.lane.b32.xlu0 %v1829_v6, %s1904_s3 }
 0x9d4   :  { %v1831_v10 = vpop.eup %1830 }
 0x9d5   :  { %v826_v11 = vadd.f32 1.0, %v1831_v10 }
 0x9d7   :  { %1832 = vrcp.f32 %v826_v11 }
 0x9e1   :  { %v1833_v12 = vpop.eup %1832 }
 0x9e2   :  { %v829_v16 = vmul.f32 %v1833_v12, %v741_v60 }
 0xa43   :  { %v832_v14 = vpop.permute.xlu0 %831 }
 0xa44   :  { %v834_v15 = vmul.f32 %v1833_v12, %v832_v14 }
 0xa46   :  { %836 = vrot.lane.b32.xlu1 %v834_v15, %s1905_s10 }
 0xab8   :  { %v837_v1 = vpop.permute.xlu1 %836 }
 0xab9   :  { %v839_v13 = vadd.f32 %v837_v1, %v829_v16 }
 0xabb   :  { %1834 = vtanh.f32 %v839_v13 }
 0xac5   :  { %v1835_v37 = vpop.eup %1834 }
 0xac6   :  { %842 = vrot.lane.b32.xlu0 %v1835_v37, %s1904_s3 }
 0xb38   :  { %v843_v17 = vpop.permute.xlu0 %842 }
 0xb39   :  { %v845_v18 = vmul.f32 %v1833_v12, %v843_v17 }
 0xb3b   :  { %847 = vrot.lane.b32.xlu1 %v845_v18, %s1905_s10 }
 0xbad   :  { %v848_v19 = vpop.permute.xlu1 %847 }
 0xbae   :  { %1628 = vmatmul.mubr.msk.f32.vlgmr.msra.gmra.mrb[20].mxu0 %vm455_vm1, %v848_v19 }
 0xbaf   :  { %1776 = vmatpush3.bf16.msra.mxu0 %v1996_v50  ;;  %1649 = vmatprep.mubr.msk.f32.mxu0 %vm1902_vm0, %v1903_v62 }
 0xbb0   :  { %1777 = vmatprep.subr.bf16.mxu0 %v1900_v41 }
 0xbb3   :  { %1779 = vmatpush3.bf16.msra.mxu0 %v2015_v56 }
 0xbb4   :  { %1786 = vmatprep.subr.bf16.mxu0 %v1900_v41 }
 0xc81   :  { %v917_v20 = vpop.f32.mrb[20].mxu0 }
 0xc82   :  { %v918_v22 = vadd.f32 %v917_v20, %v2098_v46  ;;  %v1629_v23 = vpop.f32.mrb[21].mxu0 }
 0xc84   :  { %1836 = vtanh.f32 %v918_v22  ;;  %v921_v25 = vsub.f32 0.0, %v918_v22 }
 0xc86   :  { %v922_v26 = vmul.f32 1.442695, %v921_v25 }
 0xc88   :  { %1838 = vpow2.f32 %v922_v26 }
 0xc8e   :  { %v1837_v24 = vpop.eup %1836 }
 0xc8f   :  { %929 = vrot.lane.b32.xlu0 %v1837_v24, %s1904_s3 }
 0xc92   :  { %v1839_v27 = vpop.eup %1838 }
 0xc93   :  { %v924_v28 = vadd.f32 1.0, %v1839_v27  ;;  %v1239_v27 = vld [vmem:[%s2210_s4 + $0x8] sm:$0xff] }
 0xc95   :  { %1840 = vrcp.f32 %v924_v28  ;;  %v1240_v28 = vld [vmem:[%s2210_s4 + $0x10] sm:$0xff] }
 0xc9f   :  { %v1841_v30 = vpop.eup %1840 }
 0xca0   :  { %v927_v33 = vmul.f32 %v1841_v30, %v839_v13 }
 0xd01   :  { %v930_v31 = vpop.permute.xlu0 %929 }
 0xd02   :  { %v932_v32 = vmul.f32 %v1841_v30, %v930_v31  ;;  %v1241_v31 = vld [vmem:[%s2210_s4 + $0x18] sm:$0xff] }
 0xd04   :  { %934 = vrot.lane.b32.xlu1 %v932_v32, %s1905_s10  ;;  %v1790_v32 = vpack.c.bf16 %v1241_v31, %v1240_v28 }
 0xd76   :  { %v935_v34 = vpop.permute.xlu1 %934 }
 0xd77   :  { %v937_v35 = vadd.f32 %v935_v34, %v927_v33 }
 0xd79   :  { %1842 = vtanh.f32 %v937_v35 }
 0xd83   :  { %v1843_v46 = vpop.eup %1842 }
 0xd84   :  { %940 = vrot.lane.b32.xlu0 %v1843_v46, %s1904_s3 }
 0xdf6   :  { %v941_v36 = vpop.permute.xlu0 %940 }
 0xdf7   :  { %v943_v38 = vmul.f32 %v1841_v30, %v941_v36  ;;  %v1416_v36 = vld [vmem:[%s2211_s5] ss:$0 sm:$0xff] }
 0xdf9   :  { %945 = vrot.lane.b32.xlu1 %v943_v38, %s1905_s10 }
 0xe6b   :  { %v946_v21 = vpop.permute.xlu1 %945 }
 0xe6c   :  { %1639 = vmatmul.mubr.msk.f32.vlgmr.msra.gmra.mrb[20].mxu1 %vm455_vm1, %v946_v21 }
 0xe6d   :  { %1782 = vmatpush3.bf16.msra.mxu1 %v1996_v50  ;;  %1660 = vmatprep.mubr.msk.f32.mxu1 %vm1902_vm0, %v1903_v62 }
 0xe6e   :  { %1783 = vmatprep.subr.bf16.mxu1 %v1900_v41 }
 0xe71   :  { %1785 = vmatpush3.bf16.msra.mxu1 %v2015_v56 }
 0xf3f   :  { %v1015_v39 = vpop.f32.mrb[20].mxu1 }
 0xf40   :  { %v1016_v40 = vadd.f32 %v1015_v39, %v2100_v55  ;;  %v1640_v42 = vpop.f32.mrb[21].mxu1 }
 0xf42   :  { %1844 = vtanh.f32 %v1016_v40  ;;  %v1019_v44 = vsub.f32 0.0, %v1016_v40 }
 0xf44   :  { %v1020_v45 = vmul.f32 1.442695, %v1019_v44 }
 0xf46   :  { %1846 = vpow2.f32 %v1020_v45 }
 0xf4c   :  { %v1845_v43 = vpop.eup %1844 }
 0xf4d   :  { %1027 = vrot.lane.b32.xlu0 %v1845_v43, %s1904_s3 }
 0xf50   :  { %v1847_v47 = vpop.eup %1846 }
 0xf51   :  { %v1022_v50 = vadd.f32 1.0, %v1847_v47 }
 0xf53   :  { %1848 = vrcp.f32 %v1022_v50 }
 0xf5d   :  { %v1849_v48 = vpop.eup %1848 }
 0xf5e   :  { %v1025_v56 = vmul.f32 %v1849_v48, %v937_v35 }
 0xfbf   :  { %v1028_v49 = vpop.permute.xlu0 %1027 }
 0xfc0   :  { %v1030_v51 = vmul.f32 %v1849_v48, %v1028_v49 }
 0xfc2   :  { %1032 = vrot.lane.b32.xlu1 %v1030_v51, %s1905_s10 }
0x1034   :  { %v1033_v52 = vpop.permute.xlu1 %1032 }
0x1035   :  { %v1035_v53 = vadd.f32 %v1033_v52, %v1025_v56 }
0x1037   :  { %1850 = vtanh.f32 %v1035_v53 }
0x1041   :  { %v1851_v55 = vpop.eup %1850 }
0x1042   :  { %1038 = vrot.lane.b32.xlu0 %v1851_v55, %s1904_s3 }
0x10b4   :  { %v1039_v54 = vpop.permute.xlu0 %1038 }
0x10b5   :  { %v1041_v57 = vmul.f32 %v1849_v48, %v1039_v54 }
0x10b7   :  { %1043 = vrot.lane.b32.xlu1 %v1041_v57, %s1905_s10 }
0x1129   :  { %v1044_v58 = vpop.permute.xlu1 %1043 }
0x112a   :  { %1650 = vmatmul.mubr.msk.f32.vlgmr.msra.gmra.mrb[22].mxu0 %vm455_vm1, %v1044_v58 }
0x112b   :  { %1671 = vmatprep.mubr.msk.f32.mxu0 %vm1902_vm0, %v1903_v62 }
0x11fd   :  { %v1113_v59 = vpop.f32.mrb[22].mxu0 }
0x11fe   :  { %v1114_v60 = vadd.f32 %v1113_v59, %v2102_v2  ;;  %v1651_v29 = vpop.f32.mrb[23].mxu0 }
0x1200   :  { %1852 = vtanh.f32 %v1114_v60  ;;  %v1117_v63 = vsub.f32 0.0, %v1114_v60 }
0x1202   :  { %v1118_v0 = vmul.f32 1.442695, %v1117_v63 }
0x1204   :  { %1854 = vpow2.f32 %v1118_v0 }
0x120a   :  { %v1853_v61 = vpop.eup %1852 }
0x120b   :  { %1125 = vrot.lane.b32.xlu0 %v1853_v61, %s1904_s3 }
0x120e   :  { %v1855_v3 = vpop.eup %1854 }
0x120f   :  { %v1120_v4 = vadd.f32 1.0, %v1855_v3 }
0x1211   :  { %1856 = vrcp.f32 %v1120_v4 }
0x121b   :  { %v1857_v5 = vpop.eup %1856 }
0x121c   :  { %v1123_v62 = vmul.f32 %v1857_v5, %v1035_v53 }
0x127d   :  { %v1126_v6 = vpop.permute.xlu0 %1125 }
0x127e   :  { %v1128_v8 = vmul.f32 %v1857_v5, %v1126_v6 }
0x1280   :  { %1130 = vrot.lane.b32.xlu1 %v1128_v8, %s1905_s10 }
0x12f2   :  { %v1131_v9 = vpop.permute.xlu1 %1130 }
0x12f3   :  { %v1133_v10 = vadd.f32 %v1131_v9, %v1123_v62 }
0x12f5   :  { %1858 = vtanh.f32 %v1133_v10 }
0x12ff   :  { %v1859_v2 = vpop.eup %1858 }
0x1300   :  { %1136 = vrot.lane.b32.xlu0 %v1859_v2, %s1904_s3 }
0x1372   :  { %v1137_v11 = vpop.permute.xlu0 %1136 }
0x1373   :  { %v1139_v12 = vmul.f32 %v1857_v5, %v1137_v11 }
0x1375   :  { %1141 = vrot.lane.b32.xlu1 %v1139_v12, %s1905_s10 }
0x13e7   :  { %v1142_v14 = vpop.permute.xlu1 %1141 }
0x13e8   :  { %1661 = vmatmul.mubr.msk.f32.vlgmr.msra.gmra.mrb[22].mxu1 %vm455_vm1, %v1142_v14 }
0x14bb   :  { %v1211_v15 = vpop.f32.mrb[22].mxu1 }
0x14bc   :  { %v1212_v16 = vadd.f32 %v1211_v15, %v2104_v7  ;;  %v1662_v1 = vpop.f32.mrb[23].mxu1  ;;  %v1238_v7 = vld [vmem:[%s2210_s4] sm:$0xff] }
0x14bd   :  { %v1787_v30 = vpack.c.bf16 %v1239_v27, %v1238_v7 }
0x14be   :  { %1860 = vtanh.f32 %v1212_v16  ;;  %v1215_v37 = vsub.f32 0.0, %v1212_v16 }
0x14bf   :  { %1788 = vmatpush3.bf16.msra.mxu0 %v1787_v30 }
0x14c0   :  { %v1216_v17 = vmul.f32 1.442695, %v1215_v37  ;;  %1789 = vmatprep.subr.bf16.mxu0 %v1900_v41 }
0x14c2   :  { %1862 = vpow2.f32 %v1216_v17 }
0x14c3   :  { %1791 = vmatpush3.bf16.msra.mxu0 %v1790_v32 }
0x14c8   :  { %v1861_v13 = vpop.eup %1860 }
0x14c9   :  { %1223 = vrot.lane.b32.xlu0 %v1861_v13, %s1904_s3 }
0x14cc   :  { %v1863_v18 = vpop.eup %1862 }
0x14cd   :  { %v1218_v19 = vadd.f32 1.0, %v1863_v18 }
0x14cf   :  { %1864 = vrcp.f32 %v1218_v19 }
0x14d9   :  { %v1865_v20 = vpop.eup %1864 }
0x14da   :  { %v1221_v24 = vmul.f32 %v1865_v20, %v1133_v10 }
0x153b   :  { %v1224_v22 = vpop.permute.xlu0 %1223 }
0x153c   :  { %v1226_v23 = vmul.f32 %v1865_v20, %v1224_v22 }
0x153e   :  { %1228 = vrot.lane.b32.xlu1 %v1226_v23, %s1905_s10 }
0x15b0   :  { %v1229_v25 = vpop.permute.xlu1 %1228 }
0x15b1   :  { %v1231_v26 = vadd.f32 %v1229_v25, %v1221_v24 }
0x15b3   :  { %1866 = vtanh.f32 %v1231_v26 }
0x15bd   :  { %v1867_v33 = vpop.eup %1866 }
0x15be   :  { %1234 = vrot.lane.b32.xlu0 %v1867_v33, %s1904_s3 }
0x1630   :  { %v1235_v34 = vpop.permute.xlu0 %1234 }
0x1631   :  { %v1237_v35 = vmul.f32 %v1865_v20, %v1235_v34 }
0x1633   :  { %1250 = vrot.lane.b32.xlu1 %v1237_v35, %s1905_s10 }
0x16a5   :  { %v1251_v46 = vpop.permute.xlu1 %1250 }
0x16a6   :  { %1672 = vmatmul.mubr.msk.f32.vlgmr.msra.gmra.mrb[24].mxu0 %vm455_vm1, %v1251_v46 }
0x1779   :  { %v1320_v38 = vpop.f32.mrb[24].mxu0 }
0x177a   :  { %v1321_v21 = vadd.f32 %v1416_v36, %v1320_v38  ;;  %v1673_v39 = vpop.f32.mrb[25].mxu0 }
0x177c   :  { %v1325_v41 = vsel %vm1324_vm2, %v1321_v21, -inf }
0x177d   :  { %1326 = vmax.xlane.f32.xlu0 %v1325_v41 }
0x180a   :  { %v1327_v40 = vpop.xlane.xlu0 %1326 }
0x180b   :  { %v1328_v42 = vsub.f32 %v1321_v21, %v1327_v40 }
0x180d   :  { %v1329_v43 = vmul.f32 1.442695, %v1328_v42 }
0x180f   :  { %1868 = vpow2.f32 %v1329_v43 }
0x1819   :  { %v1869_v44 = vpop.eup %1868 }
0x181a   :  { %v1331_v45 = vsel %vm1324_vm2, %v1869_v44, 0.0 }
0x181b   :  { %1332 = vadd.xlane.f32.xlu1 %v1331_v45 }
0x18a8   :  { %v1333_v47 = vpop.xlane.xlu1 %1332 }
0x18a9   :  { %1870 = vlog2.f32 %v1333_v47 }
0x18b3   :  { %v1871_v50 = vpop.eup %1870 }
0x18b4   :  { %v1335_v48 = vmul.f32 0.6931472, %v1871_v50 }
0x18b6   :  { %v1336_v49 = vadd.f32 %v1335_v48, %v1327_v40 }
0x18b8   :  { %v1337_v51 = vsub.f32 %v1321_v21, %v1336_v49 }
0x18ba   :  { %1338 = vst.msk [vmem:[%s2212_s6] sm:$0xff] %vm1324_vm2, %v1337_v51 }
0x18bb   :  { %1343 = vsyncpa [#allocation3], 1 }

</bundles_post_ra>
